<compile_context>
chip_gen: v7x
topology: tpu7x:2x2x1
jax: 0.10.0
libtpu: 0.0.40
codegen_flags: <defaults>
</compile_context>

<pallas_src>
import functools
import math

import jax
import jax.numpy as jnp
from jax.experimental import pallas as pl
from jax.experimental.pallas import tpu as pltpu


_MAX_LANES = 1024  # lane-dense upper bound; multiples of 128 searched downward


# --------------------------------------------------------------------------- #
# Kernel
# --------------------------------------------------------------------------- #
def _convert_kernel(x_ref, o_ref, *, scale):
    """Elementwise dtype conversion on one (row_tile, lanes) block."""
    x = x_ref[...]
    if scale is None:
        # float -> float: pure cast, no dead multiply / intermediate f32.
        o_ref[...] = x.astype(o_ref.dtype)
    else:
        # int -> float: cast to f32, scale by 1/max(input int dtype), cast out.
        o_ref[...] = (x.astype(jnp.float32) * jnp.float32(scale)).astype(o_ref.dtype)


# --------------------------------------------------------------------------- #
# Generation-aware tiling
# --------------------------------------------------------------------------- #
@functools.lru_cache(maxsize=None)
def _vmem_budgets():
    """(double-buffered tile budget, vmem_limit_bytes) for this TPU generation."""
    small_vmem = False
    try:  # preferred: direct VMEM capacity query
        cap = getattr(pltpu.get_tpu_info(), "vmem_capacity_bytes", None)
        if cap and int(cap) <= 96 * 1024 * 1024:
            small_vmem = True  # v7x-class: 64 MiB VMEM per TensorCore
    except Exception:
        pass
    try:  # fallback: device-kind string
        kind = jax.devices()[0].device_kind.lower()
        if "v7" in kind or "7x" in kind:
            small_vmem = True
    except Exception:
        pass
    if small_vmem:
        # v7x: keep double-buffered tiles ~20 MiB, never push limit past ~32 MiB.
        return 20 * 1024 * 1024, 32 * 1024 * 1024
    # v5e / v6e: 128 MiB physical VMEM -> bigger tiles, fewer grid steps.
    return 40 * 1024 * 1024, 64 * 1024 * 1024


def _select_row_tile(rows, lanes, in_itemsize, out_itemsize):
    """Pick row tile (multiple of 32) and the VMEM limit for this dtype pair."""
    tile_budget, vmem_limit = _vmem_budgets()
    row_bytes = (in_itemsize + out_itemsize) * lanes
    # Largest tile whose double-buffered in+out footprint fits the budget.
    max_tr = max(32, (tile_budget // (2 * row_bytes)) // 32 * 32)
    if rows < 64:
        tr = rows  # full-extent row block (exempt from (8,128) divisibility)
    elif rows <= max_tr:
        # Guarantee >= 2 grid steps so "parallel" engages both v7x TensorCores.
        tr = ((rows + 1) // 2 + 31) // 32 * 32
    else:
        tr = max_tr
    return tr, vmem_limit


# --------------------------------------------------------------------------- #
# pallas_call wrapper on a lane-dense 2D slab
# --------------------------------------------------------------------------- #
def _pallas_convert_2d(x2d, out_dtype, scale):
    rows, lanes = x2d.shape
    in_itemsize = x2d.dtype.itemsize
    out_itemsize = jnp.dtype(out_dtype).itemsize
    tr, vmem_limit = _select_row_tile(rows, lanes, in_itemsize, out_itemsize)
    grid = (pl.cdiv(rows, tr),)

    kernel = functools.partial(_convert_kernel, scale=scale)
    return pl.pallas_call(
        kernel,
        out_shape=jax.ShapeDtypeStruct((rows, lanes), out_dtype),
        grid=grid,
        in_specs=[pl.BlockSpec((tr, lanes), lambda i: (i, 0))],
        out_specs=pl.BlockSpec((tr, lanes), lambda i: (i, 0)),
        # TODO(synk): sweep pipeline_mode=pl.Buffered(3) on out_specs only if an
        # xprof trace shows exposed output-writeback DMA (f32 stream is 4x the
        # u8 input stream); extra buffer counts against the tighter v7x VMEM.
        compiler_params=pltpu.CompilerParams(
            # Shards the tiled grid across both v7x TensorCores; no-op on
            # single-TC v5e/v6e.
            dimension_semantics=("parallel",),
            vmem_limit_bytes=vmem_limit,
        ),
        cost_estimate=pl.CostEstimate(
            flops=0 if scale is None else rows * lanes,
            transcendentals=0,
            bytes_accessed=rows * lanes * (in_itemsize + out_itemsize),
        ),
    )(x2d)


# --------------------------------------------------------------------------- #
# Conversion paths (jitted so reshape/kernel fuse into one dispatch)
# --------------------------------------------------------------------------- #
@functools.partial(jax.jit, static_argnames=("out_dtype", "scale", "lanes"))
def _convert_aligned(image, *, out_dtype, scale, lanes):
    """Common path: element count divisible by `lanes` -> zero-copy reshape."""
    shape = image.shape
    total = math.prod(shape)
    rows = total // lanes
    y2d = _pallas_convert_2d(image.reshape(rows, lanes), out_dtype, scale)
    return y2d.reshape(shape)


@functools.partial(jax.jit, static_argnames=("out_dtype", "scale"))
def _convert_padded(image, *, out_dtype, scale):
    """Rare path: total % 128 != 0 -> pad to a lane-dense slab, then slice."""
    # TODO(synk): this fallback adds an extra HBM read+write of input (pad) and
    # output (slice); acceptable only because real image shapes rarely hit it.
    shape = image.shape
    total = math.prod(shape)
    flat = image.reshape(-1)
    padded_total = -(-total // _MAX_LANES) * _MAX_LANES
    flat = jnp.pad(flat, (0, padded_total - total))
    rows = padded_total // _MAX_LANES
    y2d = _pallas_convert_2d(flat.reshape(rows, _MAX_LANES), out_dtype, scale)
    return y2d.reshape(-1)[:total].reshape(shape)


def _pick_lanes(total):
    for lanes in range(_MAX_LANES, 0, -128):
        if total % lanes == 0:
            return lanes
    return None


def convert_image_dtype(image, dtype=jnp.float32, target=None):
    """Pallas equivalent of ConvertImageDtype.forward.

    Returns (converted_image, target) to mirror the PyTorch module.
    """
    in_dtype = jnp.dtype(image.dtype)
    out_dtype = jnp.dtype(dtype)

    # Same dtype: torchvision returns the image unchanged -> skip the kernel.
    if in_dtype == out_dtype:
        return image, target

    if jnp.issubdtype(in_dtype, jnp.floating):
        if not jnp.issubdtype(out_dtype, jnp.floating):
            # TODO(synk): float -> integer path of convert_image_dtype
            # (scale by (max+1-eps) then truncate) not implemented.
            raise NotImplementedError("float -> int conversion not implemented")
        scale = None  # pure cast
    elif jnp.issubdtype(in_dtype, jnp.integer):
        if not jnp.issubdtype(out_dtype, jnp.floating):
            # TODO(synk): integer -> integer rescaling path not implemented.
            raise NotImplementedError("int -> int conversion not implemented")
        scale = 1.0 / float(jnp.iinfo(in_dtype).max)
    else:
        raise NotImplementedError(f"unsupported input dtype {in_dtype}")

    shape = image.shape
    total = math.prod(shape) if shape else 1
    if total == 0:
        return image.astype(out_dtype), target

    lanes = _pick_lanes(total)
    if lanes is not None:
        y = _convert_aligned(image, out_dtype=out_dtype, scale=scale, lanes=lanes)
    else:
        y = _convert_padded(image, out_dtype=out_dtype, scale=scale)
    return y, target


# --------------------------------------------------------------------------- #
# Self-test
# --------------------------------------------------------------------------- #
if __name__ == "__main__":
    key = jax.random.PRNGKey(0)

    # Typical use: uint8 image (NCHW) -> float32 in [0, 1].
    x_u8 = jax.random.randint(
        key, shape=(2, 4, 16, 16), minval=0, maxval=256, dtype=jnp.int32
    ).astype(jnp.uint8)
    out, tgt = convert_image_dtype(x_u8, dtype=jnp.float32, target=None)
    out = jax.block_until_ready(out)
    ref = x_u8.astype(jnp.float32) / 255.0
    assert out.dtype == jnp.float32
    assert out.shape == (2, 4, 16, 16)
    assert jnp.max(jnp.abs(out - ref)) < 1e-6
    assert tgt is None

    # Float -> float (different dtype): pure cast.
    x_f32 = jax.random.uniform(key, (2, 4, 16, 16), dtype=jnp.float32)
    out_bf16, _ = convert_image_dtype(x_f32, dtype=jnp.bfloat16)
    out_bf16 = jax.block_until_ready(out_bf16)
    assert out_bf16.dtype == jnp.bfloat16
    assert jnp.max(jnp.abs(out_bf16.astype(jnp.float32) - x_f32)) < 1e-2

    # Same dtype: early return, no kernel launch, identical object.
    same, _ = convert_image_dtype(x_f32, dtype=jnp.float32)
    assert same is x_f32

    # Misaligned element count (total % 128 != 0): exercises the pad fallback.
    x_odd = jax.random.randint(
        key, shape=(3, 17, 31), minval=0, maxval=256, dtype=jnp.int32
    ).astype(jnp.uint8)
    out_odd, _ = convert_image_dtype(x_odd, dtype=jnp.float32)
    out_odd = jax.block_until_ready(out_odd)
    assert out_odd.shape == (3, 17, 31)
    assert jnp.max(jnp.abs(out_odd - x_odd.astype(jnp.float32) / 255.0)) < 1e-6

    print("KERNEL_OK")
</pallas_src>

<mosaic_0001>
module attributes {stable_mosaic.version = 11 : i64} {
  func.func @_convert_kernel(%arg0: i32, %arg1: memref<2x1024xi8, #tpu.memory_space<vmem>>, %arg2: memref<2x1024xf32, #tpu.memory_space<vmem>>) attributes {dimension_semantics = [#tpu.dimension_semantics<parallel>], iteration_bounds = array<i64: 1>, scalar_prefetch = 0 : i64, scratch_operands = 0 : i64, tpu.core_type = #tpu.core_type<tc>, window_params = [{transform_indices = @transform_0, window_bounds = array<i64: 2, 1024>}, {transform_indices = @transform_1, window_bounds = array<i64: 2, 1024>}]} {
    %c0 = arith.constant 0 : index
    %c0_0 = arith.constant 0 : index
    %0 = vector.load %arg1[%c0, %c0_0] : memref<2x1024xi8, #tpu.memory_space<vmem>>, vector<2x1024xi8>
    %1 = arith.uitofp %0 : vector<2x1024xi8> to vector<2x1024xf32>
    %cst = arith.constant 0.00392156886 : f32
    %2 = vector.broadcast %cst : f32 to vector<2x1024xf32>
    %3 = arith.mulf %1, %2 : vector<2x1024xf32>
    %c0_1 = arith.constant 0 : index
    %c0_2 = arith.constant 0 : index
    %4 = vector.load %arg2[%c0_1, %c0_2] : memref<2x1024xf32, #tpu.memory_space<vmem>>, vector<2x1024xf32>
    tpu.vector_store %arg2[%c0_1, %c0_2], %3 {strides = array<i32>} : memref<2x1024xf32, #tpu.memory_space<vmem>>, vector<2x1024xf32>,
    return
  }
  func.func @transform_0(%arg0: i32) -> (i32, i32) {
    %c0_i32 = arith.constant 0 : i32
    %c0_i32_0 = arith.constant 0 : i32
    return %arg0, %c0_i32 : i32, i32
  }
  func.func @transform_1(%arg0: i32) -> (i32, i32) {
    %c0_i32 = arith.constant 0 : i32
    %c0_i32_0 = arith.constant 0 : i32
    return %arg0, %c0_i32 : i32, i32
  }
}

</mosaic_0001>

<bundles_post_ra>
// kernel: _convert_aligned.1
= control target key start
LH: loop header
LB: loop body
LE: loop exit
PB: predicated region body
PF: predicated region fallthrough
CT: control target
= control target key end

     0   :  { %6 = vsyncpa [#allocation3], 0  ;;  %s179_s0 = inlined_call_operand.hbm [shape: u8[2,1024], index: 0, kind: input, shape index: {}]   ;;  %s180_s1 = inlined_call_operand.hbm [shape: f32[2,1024], index: 1, kind: output, shape index: {}]  }
   0x1   :  { %7 = vsyncpa [#allocation4], 0  ;;  %s142_s6 = smov [#allocation2]   ;;  %s94_s10 = scalar_lea.hbm %s179_s0, 128 }
   0x2   :  { %s14_s7 = sshll.u32 %s142_s6, 4  ;;  %p95_p0 = scmp.ne.s32.totalorder %s179_s0, %s94_s10  ;;  %s15_s7 = int_to_ptr.vmem [resolvable:$true] %s14_s7 }
   0x3   :  { %p98_p1 = scmp.lt.u32.totalorder %s94_s10, %s179_s0 }
   0x5   :  { %p100_p2 = pnand %p98_p1, %p95_p0 }
   0x7   :  { %103 = shalt.err (!%p100_p2)
}
   0x8   :  { %s104_s15 = scalar_lea.vmem %s15_s7, 128  ;;  %p109_p4 = scmp.lt.s32.totalorder %s15_s7, %s15_s7 }
   0x9   :  { %p105_p3 = scmp.ne.s32.totalorder %s15_s7, %s104_s15  ;;  %p110_p5 = scmp.lt.s32.totalorder %s104_s15, %s104_s15 }
   0xb   :  { %p111_p6 = por %p110_p5, %p109_p4 }
   0xd   :  { %p112_p7 = pnand %p111_p6, %p105_p3 }
   0xf   :  { %115 = shalt.err (!%p112_p7)
}
  0x10   :  { %17 = dma.hbm_to_vmem [thread:$0]  %s179_s0, 128, %s15_s7, [#allocation3]  }
  0x11   :  { %138 = dma.done.wait [#allocation3], 128  }
  0x12   :  { %139 = vsyncadd [#allocation3], 4294967168  ;;  %v143_v0 = vmov 1983009808   ;;  %v45_v2 = vlaneseq  ;;  %v21_v3 = vld [vmem:[#allocation2] sm:$0xff]  ;;  %s144_s0 = smov [#allocation5]  }
  0x13   :  { %v43_v1 = vunpack.c.l.s4 %v143_v0  ;;  %v22_v6 = vunpack.c.0.s8 %v21_v3  ;;  %v23_v7 = vunpack.c.1.s8 %v21_v3  ;;  %v24_v8 = vunpack.c.2.s8 %v21_v3  ;;  %s82_s18 = sshll.u32 %s144_s0, 4  ;;  %s83_s18 = int_to_ptr.vmem [resolvable:$true] %s82_s18 }
  0x14   :  { %v46_v5 = vshrl.u32 %v45_v2, 7  ;;  %v25_v9 = vunpack.c.3.s8 %v21_v3  ;;  %s116_s19 = scalar_lea.vmem %s83_s18, 256  ;;  %p121_p9 = scmp.lt.s32.totalorder %s83_s18, %s83_s18 }
  0x15   :  { %v44_v4 = vunpack.c.0.s8 %v43_v1  ;;  %v26_v10 = vand.u32 255, %v22_v6  ;;  %v27_v11 = vand.u32 255, %v23_v7  ;;  %v28_v12 = vand.u32 255, %v24_v8  ;;  %p117_p8 = scmp.ne.s32.totalorder %s83_s18, %s116_s19  ;;  %p122_p10 = scmp.lt.s32.totalorder %s116_s19, %s116_s19 }
  0x16   :  { %v29_v13 = vand.u32 255, %v25_v9 }
  0x17   :  { %v47_v14 = vsub.s32 %v44_v4, %v46_v5  ;;  %v30_v15 = vcvt.s32.f32 %v26_v10  ;;  %v31_v16 = vcvt.s32.f32 %v27_v11  ;;  %v32_v17 = vcvt.s32.f32 %v28_v12  ;;  %p123_p11 = por %p122_p10, %p121_p9 }
  0x18   :  { %v33_v18 = vcvt.s32.f32 %v29_v13 }
  0x19   :  { %v34_v19 = vmul.f32 0.003921569, %v30_v15  ;;  %v35_v20 = vmul.f32 0.003921569, %v31_v16  ;;  %v36_v21 = vmul.f32 0.003921569, %v32_v17  ;;  %p124_p12 = pnand %p123_p11, %p117_p8 }
  0x1a   :  { %v37_v22 = vmul.f32 0.003921569, %v33_v18 }
  0x1b   :  { %v48_v23 = vrot.slane %v34_v19, %v47_v14  ;;  %v55_v24 = vrot.slane %v35_v20, %v47_v14  ;;  %v63_v25 = vrot.slane %v36_v21, %v47_v14 }
  0x1c   :  { %v70_v26 = vrot.slane %v37_v22, %v47_v14 }
  0x1d   :  { %v56_v27 = vcombine.low %v48_v23, %v55_v24 }
  0x1e   :  { %v71_v28 = vcombine.low %v63_v25, %v70_v26 }
  0x1f   :  { %74 = vst [vmem:[#allocation5] sm:$0xff] %v56_v27 }
  0x20   :  { %75 = vst [vmem:[#allocation5 + $0x8] sm:$0xff] %v71_v28 }
  0x21   :  { %127 = shalt.err (!%p124_p12)
}
  0x22   :  { %s128_s22 = scalar_lea.hbm %s180_s1, 256 }
  0x23   :  { %p129_p13 = scmp.ne.s32.totalorder %s180_s1, %s128_s22  ;;  %p132_p0 = scmp.lt.u32.totalorder %s128_s22, %s180_s1 }
  0x25   :  { %p134_p1 = pnand %p132_p0, %p129_p13 }
  0x27   :  { %137 = shalt.err (!%p134_p1)
}
  0x28   :  { %85 = dma.vmem_to_hbm [thread:$0]  %s83_s18, 256, %s180_s1, [#allocation4]  }
  0x29   :  { %140 = dma.done.wait [#allocation4], 256  }
  0x2a   :  { %141 = vsyncadd [#allocation4], 4294967040 }
  0x2b   :  { %89 = vsyncpa [#allocation3], 1 }
  0x2c   :  { %90 = vsyncpa [#allocation4], 1 }

</bundles_post_ra>
